<compile_context>
chip_gen: v5e
topology: v5e:2x2
jax: 0.10.0
libtpu: 0.0.40
codegen_flags: <defaults>
</compile_context>

<pallas_src>
import math
import functools

import numpy as np
import jax
import jax.numpy as jnp
from jax import lax
from jax.experimental import pallas as pl
from jax.experimental.pallas import tpu as pltpu


# ---------------- kernel ----------------

def _make_esn_kernel(tt, B):
    """tt = timesteps per grid tile, B = batch (both static)."""

    def kernel(emb_ref,          # (tt*B, E) bf16   rows ordered (t, b)
               w_in_ref,         # (E, R)   bf16    input_proj.weight^T
               w_ih_ref,         # (R, R)   bf16    rnn.weight_ih^T
               w_hh_ref,         # (R, R)   bf16    rnn.weight_hh^T
               bias_ref,         # (1, R)   f32     b_ih + b_hh
               w1_ref,           # (R, S)   bf16    lm_head1.weight^T
               w2_ref,           # (R, S)   bf16    lm_head2.weight^T
               hN_ref,           # out (B, R) f32   final reservoir state
               lp1_ref,          # out (B, S) f32   log_softmax(lm_head1(h_T))
               lp2_ref,          # out (B, S) f32   log_softmax(lm_head2(h_T))
               h_scratch):       # VMEM (B, R) f32  carried reservoir state
        # -- init carry on the first time tile --
        @pl.when(pl.program_id(0) == 0)
        def _init():
            h_scratch[...] = jnp.zeros_like(h_scratch)

        # -- batched input-side projections for the whole tile (big MXU matmuls, bf16) --
        proj = jnp.dot(emb_ref[...], w_in_ref[...],
                       preferred_element_type=jnp.float32)            # (tt*B, R) f32
        pre = jnp.dot(proj.astype(jnp.bfloat16), w_ih_ref[...],
                      preferred_element_type=jnp.float32)             # (tt*B, R) f32
        pre = pre + bias_ref[...]                                     # + (b_ih + b_hh)

        # -- sequential reservoir recurrence over the tile (unavoidable dependence) --
        w_hh = w_hh_ref[...]
        h = h_scratch[...]                                            # (B, R) f32
        for t in range(tt):                                           # static unroll, tt small
            rec = jnp.dot(h.astype(jnp.bfloat16), w_hh,
                          preferred_element_type=jnp.float32)         # (B, R) f32
            h = jnp.tanh(pre[t * B:(t + 1) * B, :] + rec)
        h_scratch[...] = h                                            # carry to next tile

        # -- last tile: lm heads + log-softmax on the final hidden state --
        @pl.when(pl.program_id(0) == pl.num_programs(0) - 1)
        def _finalize():
            hb = h.astype(jnp.bfloat16)
            l1 = jnp.dot(hb, w1_ref[...], preferred_element_type=jnp.float32)   # (B, S)
            l2 = jnp.dot(hb, w2_ref[...], preferred_element_type=jnp.float32)   # (B, S)

            def log_softmax(l):
                m = jnp.max(l, axis=-1, keepdims=True)
                s = jnp.sum(jnp.exp(l - m), axis=-1, keepdims=True)
                return (l - m) - jnp.log(s)

            hN_ref[...] = h.astype(hN_ref.dtype)
            lp1_ref[...] = log_softmax(l1).astype(lp1_ref.dtype)
            lp2_ref[...] = log_softmax(l2).astype(lp2_ref.dtype)

    return kernel


# ---------------- wrapper ----------------

@functools.partial(jax.jit, static_argnames=("tt", "vocab_size"))
def esn_forward(idx, wte, w_in_t, w_ih_t, w_hh_t, bias, w1_t, w2_t, *, tt, vocab_size):
    """Pallas-backed ESN forward, inference path (targets=None, return_logits=True)."""
    B, T = idx.shape
    E = wte.shape[1]
    R = w_hh_t.shape[0]
    S = w1_t.shape[1]
    assert T % tt == 0
    num_tiles = T // tt

    # Embedding lookup (gather) stays in the wrapper; activations go to the kernel as bf16.
    # TODO(synk): targets/loss path (cross-entropy over all timesteps) is not kernelized.
    emb = jnp.take(wte, idx, axis=0)                                   # (B, T, E) f32
    emb_tb = jnp.transpose(emb, (1, 0, 2)).reshape(T * B, E).astype(jnp.bfloat16)

    kernel = _make_esn_kernel(tt, B)

    hN, lp1, lp2 = pl.pallas_call(
        kernel,
        out_shape=(jax.ShapeDtypeStruct((B, R), jnp.float32),
                   jax.ShapeDtypeStruct((B, S), jnp.float32),
                   jax.ShapeDtypeStruct((B, S), jnp.float32)),
        grid_spec=pltpu.PrefetchScalarGridSpec(
            num_scalar_prefetch=0,
            grid=(num_tiles,),
            in_specs=[
                pl.BlockSpec((tt * B, E), lambda i: (i, 0)),   # streamed time tile
                pl.BlockSpec(w_in_t.shape, lambda i: (0, 0)),  # grid-invariant weights:
                pl.BlockSpec(w_ih_t.shape, lambda i: (0, 0)),  # constant index map -> single DMA,
                pl.BlockSpec(w_hh_t.shape, lambda i: (0, 0)),  # VMEM-resident for whole grid
                pl.BlockSpec(bias.shape, lambda i: (0, 0)),
                pl.BlockSpec(w1_t.shape, lambda i: (0, 0)),
                pl.BlockSpec(w2_t.shape, lambda i: (0, 0)),
            ],
            out_specs=(pl.BlockSpec((B, R), lambda i: (0, 0)),
                       pl.BlockSpec((B, S), lambda i: (0, 0)),
                       pl.BlockSpec((B, S), lambda i: (0, 0))),
            scratch_shapes=[pltpu.VMEM((B, R), jnp.float32)],
        ),
        compiler_params=pltpu.CompilerParams(
            dimension_semantics=("arbitrary",)),   # time axis carries state sequentially
    )(emb_tb, w_in_t, w_ih_t, w_hh_t, bias, w1_t, w2_t)

    # Combine the two factorized log-prob heads -> (B, 1, vocab_size)  [tiny, wrapper-side]
    combined = lp1[:, None, :, None] + lp2[:, None, None, :]           # (B, 1, S, S)
    logits = combined.reshape(B, 1, S * S)[:, :, :vocab_size]
    h_n = hN[None, :, :]                                               # (1, B, R) like torch h_n
    return logits, None, h_n


# ---------------- pure-JAX reference (same bf16 matmul precision) ----------------

def ref_esn_forward(idx, wte, w_in_t, w_ih_t, w_hh_t, bias, w1_t, w2_t, vocab_size):
    B, T = idx.shape
    R = w_hh_t.shape[0]
    S = w1_t.shape[1]

    emb = jnp.take(wte, idx, axis=0).astype(jnp.bfloat16)              # (B, T, E)
    proj = lax.dot_general(emb, w_in_t, (((2,), (0,)), ((), ())),
                           preferred_element_type=jnp.float32)         # (B, T, R)
    pre = lax.dot_general(proj.astype(jnp.bfloat16), w_ih_t, (((2,), (0,)), ((), ())),
                          preferred_element_type=jnp.float32) + bias[0]
    pre_t = jnp.transpose(pre, (1, 0, 2))                              # (T, B, R)

    def step(h, p):
        rec = jnp.dot(h.astype(jnp.bfloat16), w_hh_t, preferred_element_type=jnp.float32)
        h = jnp.tanh(p + rec)
        return h, None

    h_n, _ = lax.scan(step, jnp.zeros((B, R), jnp.float32), pre_t)

    l1 = jnp.dot(h_n.astype(jnp.bfloat16), w1_t, preferred_element_type=jnp.float32)
    l2 = jnp.dot(h_n.astype(jnp.bfloat16), w2_t, preferred_element_type=jnp.float32)
    lp1 = jax.nn.log_softmax(l1, axis=-1)
    lp2 = jax.nn.log_softmax(l2, axis=-1)
    logits = (lp1[:, None, :, None] + lp2[:, None, None, :]).reshape(B, 1, S * S)
    return logits[:, :, :vocab_size], h_n[None]


# ---------------- main ----------------

if __name__ == "__main__":
    # small ESN config (consistent with the module: V, E, R, light lm head)
    vocab_size = 250
    embed_dim = 64
    reservoir_size = 128          # multiple of 128 -> lane-dense reservoir activations
    spectral_radius = 0.99
    input_scaling = 0.1
    sqrt_vocab = int(math.ceil(math.sqrt(vocab_size)))   # 16

    B, T = 2, 16
    tt = 8                        # timesteps per grid tile -> grid=(2,)

    key = jax.random.PRNGKey(0)
    (k_wte, k_in, k_ih, k_hh, k_bih, k_bhh, k_w1, k_w2, k_idx) = jax.random.split(key, 9)

    # ---- parameters, torch layouts / torch-style init ----
    wte = 0.02 * jax.random.normal(k_wte, (vocab_size, embed_dim), jnp.float32)
    W_in = jax.random.uniform(k_in, (reservoir_size, embed_dim), jnp.float32,
                              -input_scaling, input_scaling)            # (R, E)
    W_ih = jax.random.uniform(k_ih, (reservoir_size, reservoir_size), jnp.float32, -1.0, 1.0)
    W_hh = jax.random.uniform(k_hh, (reservoir_size, reservoir_size), jnp.float32, -1.0, 1.0)
    # spectral-radius rescaling of W_hh (init-time only; numpy eig on host)
    eig_max = float(np.abs(np.linalg.eigvals(np.asarray(W_hh, dtype=np.float64))).max())
    W_hh = W_hh * (spectral_radius / max(eig_max, 1e-9))
    b_ih = jax.random.uniform(k_bih, (reservoir_size,), jnp.float32, -0.1, 0.1)
    b_hh = jax.random.uniform(k_bhh, (reservoir_size,), jnp.float32, -0.1, 0.1)
    lm_bound = 1.0 / math.sqrt(reservoir_size)
    W1 = jax.random.uniform(k_w1, (sqrt_vocab, reservoir_size), jnp.float32, -lm_bound, lm_bound)
    W2 = jax.random.uniform(k_w2, (sqrt_vocab, reservoir_size), jnp.float32, -lm_bound, lm_bound)

    idx = jax.random.randint(k_idx, (B, T), 0, vocab_size)

    # ---- kernel-layout weights: pre-transposed to (in, out), stored as bf16 in HBM ----
    w_in_t = W_in.T.astype(jnp.bfloat16)     # (E, R)
    w_ih_t = W_ih.T.astype(jnp.bfloat16)     # (R, R)
    w_hh_t = W_hh.T.astype(jnp.bfloat16)     # (R, R)
    w1_t = W1.T.astype(jnp.bfloat16)         # (R, S)
    w2_t = W2.T.astype(jnp.bfloat16)         # (R, S)
    bias = (b_ih + b_hh).reshape(1, reservoir_size).astype(jnp.float32)

    logits, loss, h_n = esn_forward(idx, wte, w_in_t, w_ih_t, w_hh_t, bias, w1_t, w2_t,
                                    tt=tt, vocab_size=vocab_size)
    logits = jax.block_until_ready(logits)
    h_n = jax.block_until_ready(h_n)

    ref_logits, ref_h_n = ref_esn_forward(idx, wte, w_in_t, w_ih_t, w_hh_t, bias,
                                          w1_t, w2_t, vocab_size)

    assert logits.shape == (B, 1, vocab_size)
    assert h_n.shape == (1, B, reservoir_size)
    assert loss is None
    err_logits = float(jnp.max(jnp.abs(logits - ref_logits)))
    err_state = float(jnp.max(jnp.abs(h_n - ref_h_n)))
    assert err_logits < 2e-2, f"logits mismatch vs reference: {err_logits}"
    assert err_state < 2e-2, f"state mismatch vs reference: {err_state}"
    print("KERNEL_OK")
</pallas_src>

<mosaic_0001>
module attributes {stable_mosaic.version = 11 : i64} {
  func.func @kernel(%arg0: i32, %arg1: memref<16x64xbf16, #tpu.memory_space<vmem>>, %arg2: memref<64x128xbf16, #tpu.memory_space<vmem>>, %arg3: memref<128x128xbf16, #tpu.memory_space<vmem>>, %arg4: memref<128x128xbf16, #tpu.memory_space<vmem>>, %arg5: memref<1x128xf32, #tpu.memory_space<vmem>>, %arg6: memref<128x16xbf16, #tpu.memory_space<vmem>>, %arg7: memref<128x16xbf16, #tpu.memory_space<vmem>>, %arg8: memref<2x128xf32, #tpu.memory_space<vmem>>, %arg9: memref<2x16xf32, #tpu.memory_space<vmem>>, %arg10: memref<2x16xf32, #tpu.memory_space<vmem>>, %arg11: memref<2x128xf32, #tpu.memory_space<vmem>>) attributes {dimension_semantics = [#tpu.dimension_semantics<arbitrary>], iteration_bounds = array<i64: 2>, scalar_prefetch = 0 : i64, scratch_operands = 1 : i64, tpu.core_type = #tpu.core_type<tc>, window_params = [{transform_indices = @transform_0, window_bounds = array<i64: 16, 64>}, {pipeline_mode = #tpu.pipeline_mode<synchronous>, transform_indices = @transform_1, window_bounds = array<i64: 64, 128>}, {pipeline_mode = #tpu.pipeline_mode<synchronous>, transform_indices = @transform_2, window_bounds = array<i64: 128, 128>}, {pipeline_mode = #tpu.pipeline_mode<synchronous>, transform_indices = @transform_3, window_bounds = array<i64: 128, 128>}, {pipeline_mode = #tpu.pipeline_mode<synchronous>, transform_indices = @transform_4, window_bounds = array<i64: 1, 128>}, {pipeline_mode = #tpu.pipeline_mode<synchronous>, transform_indices = @transform_5, window_bounds = array<i64: 128, 16>}, {pipeline_mode = #tpu.pipeline_mode<synchronous>, transform_indices = @transform_6, window_bounds = array<i64: 128, 16>}, {pipeline_mode = #tpu.pipeline_mode<synchronous>, transform_indices = @transform_7, window_bounds = array<i64: 2, 128>}, {pipeline_mode = #tpu.pipeline_mode<synchronous>, transform_indices = @transform_8, window_bounds = array<i64: 2, 16>}, {pipeline_mode = #tpu.pipeline_mode<synchronous>, transform_indices = @transform_9, window_bounds = array<i64: 2, 16>}]} {
    %c0_i32 = arith.constant 0 : i32
    %0 = arith.cmpi eq, %arg0, %c0_i32 : i32
    %1 = arith.extui %0 : i1 to i32
    %c0_i32_0 = arith.constant 0 : i32
    %2 = arith.cmpi ne, %1, %c0_i32_0 : i32
    scf.if %2 {
      %cst_24 = arith.constant 0.000000e+00 : f32
      %58 = vector.broadcast %cst_24 : f32 to vector<2x128xf32>
      %c0_25 = arith.constant 0 : index
      %c0_26 = arith.constant 0 : index
      %59 = vector.load %arg11[%c0_25, %c0_26] : memref<2x128xf32, #tpu.memory_space<vmem>>, vector<2x128xf32>
      tpu.vector_store %arg11[%c0_25, %c0_26], %58 {strides = array<i32>} : memref<2x128xf32, #tpu.memory_space<vmem>>, vector<2x128xf32>,
    } else {
    }
    %c0 = arith.constant 0 : index
    %c0_1 = arith.constant 0 : index
    %3 = vector.load %arg1[%c0, %c0_1] : memref<16x64xbf16, #tpu.memory_space<vmem>>, vector<16x64xbf16>
    %c0_2 = arith.constant 0 : index
    %c0_3 = arith.constant 0 : index
    %4 = vector.load %arg2[%c0_2, %c0_3] : memref<64x128xbf16, #tpu.memory_space<vmem>>, vector<64x128xbf16>
    %cst = arith.constant dense<0.000000e+00> : vector<16x128xf32>
    %5 = tpu.matmul %3, %4, %cst {dimension_numbers = #tpu.dot_dimension_numbers<[1], [0], [0], [1], [0, 0, 1, 1], [], []>} : vector<16x64xbf16>, vector<64x128xbf16>, vector<16x128xf32> -> vector<16x128xf32>
    %6 = arith.truncf %5 : vector<16x128xf32> to vector<16x128xbf16>
    %c0_4 = arith.constant 0 : index
    %c0_5 = arith.constant 0 : index
    %7 = vector.load %arg3[%c0_4, %c0_5] : memref<128x128xbf16, #tpu.memory_space<vmem>>, vector<128x128xbf16>
    %cst_6 = arith.constant dense<0.000000e+00> : vector<16x128xf32>
    %8 = tpu.matmul %6, %7, %cst_6 {dimension_numbers = #tpu.dot_dimension_numbers<[1], [0], [0], [1], [0, 0, 1, 1], [], []>} : vector<16x128xbf16>, vector<128x128xbf16>, vector<16x128xf32> -> vector<16x128xf32>
    %c0_7 = arith.constant 0 : index
    %c0_8 = arith.constant 0 : index
    %9 = vector.load %arg5[%c0_7, %c0_8] : memref<1x128xf32, #tpu.memory_space<vmem>>, vector<1x128xf32>
    %10 = vector.broadcast %9 : vector<1x128xf32> to vector<16x128xf32>
    %11 = arith.addf %8, %10 : vector<16x128xf32>
    %c0_9 = arith.constant 0 : index
    %c0_10 = arith.constant 0 : index
    %12 = vector.load %arg4[%c0_9, %c0_10] : memref<128x128xbf16, #tpu.memory_space<vmem>>, vector<128x128xbf16>
    %c0_11 = arith.constant 0 : index
    %c0_12 = arith.constant 0 : index
    %13 = vector.load %arg11[%c0_11, %c0_12] : memref<2x128xf32, #tpu.memory_space<vmem>>, vector<2x128xf32>
    %14 = arith.truncf %13 : vector<2x128xf32> to vector<2x128xbf16>
    %cst_13 = arith.constant dense<0.000000e+00> : vector<2x128xf32>
    %15 = tpu.matmul %14, %12, %cst_13 {dimension_numbers = #tpu.dot_dimension_numbers<[1], [0], [0], [1], [0, 0, 1, 1], [], []>} : vector<2x128xbf16>, vector<128x128xbf16>, vector<2x128xf32> -> vector<2x128xf32>
    %16 = vector.extract_strided_slice %11 {offsets = [0, 0], sizes = [2, 128], strides = [1, 1]} : vector<16x128xf32> to vector<2x128xf32>
    %17 = arith.addf %16, %15 : vector<2x128xf32>
    %18 = math.tanh %17 : vector<2x128xf32>
    %19 = arith.truncf %18 : vector<2x128xf32> to vector<2x128xbf16>
    %cst_14 = arith.constant dense<0.000000e+00> : vector<2x128xf32>
    %20 = tpu.matmul %19, %12, %cst_14 {dimension_numbers = #tpu.dot_dimension_numbers<[1], [0], [0], [1], [0, 0, 1, 1], [], []>} : vector<2x128xbf16>, vector<128x128xbf16>, vector<2x128xf32> -> vector<2x128xf32>
    %21 = vector.extract_strided_slice %11 {offsets = [2, 0], sizes = [2, 128], strides = [1, 1]} : vector<16x128xf32> to vector<2x128xf32>
    %22 = arith.addf %21, %20 : vector<2x128xf32>
    %23 = math.tanh %22 : vector<2x128xf32>
    %24 = arith.truncf %23 : vector<2x128xf32> to vector<2x128xbf16>
    %cst_15 = arith.constant dense<0.000000e+00> : vector<2x128xf32>
    %25 = tpu.matmul %24, %12, %cst_15 {dimension_numbers = #tpu.dot_dimension_numbers<[1], [0], [0], [1], [0, 0, 1, 1], [], []>} : vector<2x128xbf16>, vector<128x128xbf16>, vector<2x128xf32> -> vector<2x128xf32>
    %26 = vector.extract_strided_slice %11 {offsets = [4, 0], sizes = [2, 128], strides = [1, 1]} : vector<16x128xf32> to vector<2x128xf32>
    %27 = arith.addf %26, %25 : vector<2x128xf32>
    %28 = math.tanh %27 : vector<2x128xf32>
    %29 = arith.truncf %28 : vector<2x128xf32> to vector<2x128xbf16>
    %cst_16 = arith.constant dense<0.000000e+00> : vector<2x128xf32>
    %30 = tpu.matmul %29, %12, %cst_16 {dimension_numbers = #tpu.dot_dimension_numbers<[1], [0], [0], [1], [0, 0, 1, 1], [], []>} : vector<2x128xbf16>, vector<128x128xbf16>, vector<2x128xf32> -> vector<2x128xf32>
    %31 = vector.extract_strided_slice %11 {offsets = [6, 0], sizes = [2, 128], strides = [1, 1]} : vector<16x128xf32> to vector<2x128xf32>
    %32 = arith.addf %31, %30 : vector<2x128xf32>
    %33 = math.tanh %32 : vector<2x128xf32>
    %34 = arith.truncf %33 : vector<2x128xf32> to vector<2x128xbf16>
    %cst_17 = arith.constant dense<0.000000e+00> : vector<2x128xf32>
    %35 = tpu.matmul %34, %12, %cst_17 {dimension_numbers = #tpu.dot_dimension_numbers<[1], [0], [0], [1], [0, 0, 1, 1], [], []>} : vector<2x128xbf16>, vector<128x128xbf16>, vector<2x128xf32> -> vector<2x128xf32>
    %36 = vector.extract_strided_slice %11 {offsets = [8, 0], sizes = [2, 128], strides = [1, 1]} : vector<16x128xf32> to vector<2x128xf32>
    %37 = arith.addf %36, %35 : vector<2x128xf32>
    %38 = math.tanh %37 : vector<2x128xf32>
    %39 = arith.truncf %38 : vector<2x128xf32> to vector<2x128xbf16>
    %cst_18 = arith.constant dense<0.000000e+00> : vector<2x128xf32>
    %40 = tpu.matmul %39, %12, %cst_18 {dimension_numbers = #tpu.dot_dimension_numbers<[1], [0], [0], [1], [0, 0, 1, 1], [], []>} : vector<2x128xbf16>, vector<128x128xbf16>, vector<2x128xf32> -> vector<2x128xf32>
    %41 = vector.extract_strided_slice %11 {offsets = [10, 0], sizes = [2, 128], strides = [1, 1]} : vector<16x128xf32> to vector<2x128xf32>
    %42 = arith.addf %41, %40 : vector<2x128xf32>
    %43 = math.tanh %42 : vector<2x128xf32>
    %44 = arith.truncf %43 : vector<2x128xf32> to vector<2x128xbf16>
    %cst_19 = arith.constant dense<0.000000e+00> : vector<2x128xf32>
    %45 = tpu.matmul %44, %12, %cst_19 {dimension_numbers = #tpu.dot_dimension_numbers<[1], [0], [0], [1], [0, 0, 1, 1], [], []>} : vector<2x128xbf16>, vector<128x128xbf16>, vector<2x128xf32> -> vector<2x128xf32>
    %46 = vector.extract_strided_slice %11 {offsets = [12, 0], sizes = [2, 128], strides = [1, 1]} : vector<16x128xf32> to vector<2x128xf32>
    %47 = arith.addf %46, %45 : vector<2x128xf32>
    %48 = math.tanh %47 : vector<2x128xf32>
    %49 = arith.truncf %48 : vector<2x128xf32> to vector<2x128xbf16>
    %cst_20 = arith.constant dense<0.000000e+00> : vector<2x128xf32>
    %50 = tpu.matmul %49, %12, %cst_20 {dimension_numbers = #tpu.dot_dimension_numbers<[1], [0], [0], [1], [0, 0, 1, 1], [], []>} : vector<2x128xbf16>, vector<128x128xbf16>, vector<2x128xf32> -> vector<2x128xf32>
    %51 = vector.extract_strided_slice %11 {offsets = [14, 0], sizes = [2, 128], strides = [1, 1]} : vector<16x128xf32> to vector<2x128xf32>
    %52 = arith.addf %51, %50 : vector<2x128xf32>
    %53 = math.tanh %52 : vector<2x128xf32>
    %c0_21 = arith.constant 0 : index
    %c0_22 = arith.constant 0 : index
    %54 = vector.load %arg11[%c0_21, %c0_22] : memref<2x128xf32, #tpu.memory_space<vmem>>, vector<2x128xf32>
    tpu.vector_store %arg11[%c0_21, %c0_22], %53 {strides = array<i32>} : memref<2x128xf32, #tpu.memory_space<vmem>>, vector<2x128xf32>,
    %c1_i32 = arith.constant 1 : i32
    %55 = arith.cmpi eq, %arg0, %c1_i32 : i32
    %56 = arith.extui %55 : i1 to i32
    %c0_i32_23 = arith.constant 0 : i32
    %57 = arith.cmpi ne, %56, %c0_i32_23 : i32
    scf.if %57 {
      %58 = arith.truncf %53 : vector<2x128xf32> to vector<2x128xbf16>
      %c0_24 = arith.constant 0 : index
      %c0_25 = arith.constant 0 : index
      %59 = vector.load %arg6[%c0_24, %c0_25] : memref<128x16xbf16, #tpu.memory_space<vmem>>, vector<128x16xbf16>
      %cst_26 = arith.constant dense<0.000000e+00> : vector<2x16xf32>
      %60 = tpu.matmul %58, %59, %cst_26 {dimension_numbers = #tpu.dot_dimension_numbers<[1], [0], [0], [1], [0, 0, 1, 1], [], []>} : vector<2x128xbf16>, vector<128x16xbf16>, vector<2x16xf32> -> vector<2x16xf32>
      %c0_27 = arith.constant 0 : index
      %c0_28 = arith.constant 0 : index
      %61 = vector.load %arg7[%c0_27, %c0_28] : memref<128x16xbf16, #tpu.memory_space<vmem>>, vector<128x16xbf16>
      %cst_29 = arith.constant dense<0.000000e+00> : vector<2x16xf32>
      %62 = tpu.matmul %58, %61, %cst_29 {dimension_numbers = #tpu.dot_dimension_numbers<[1], [0], [0], [1], [0, 0, 1, 1], [], []>} : vector<2x128xbf16>, vector<128x16xbf16>, vector<2x16xf32> -> vector<2x16xf32>
      %c0_30 = arith.constant 0 : index
      %c0_31 = arith.constant 0 : index
      %63 = vector.load %arg8[%c0_30, %c0_31] : memref<2x128xf32, #tpu.memory_space<vmem>>, vector<2x128xf32>
      tpu.vector_store %arg8[%c0_30, %c0_31], %53 {strides = array<i32>} : memref<2x128xf32, #tpu.memory_space<vmem>>, vector<2x128xf32>,
      %cst_32 = arith.constant dense<0xFF800000> : vector<2xf32>
      %64 = vector.multi_reduction <maximumf>, %60, %cst_32 [1] : vector<2x16xf32> to vector<2xf32>
      %65 = vector.shape_cast %64 : vector<2xf32> to vector<2x1xf32>
      %66 = vector.broadcast %65 : vector<2x1xf32> to vector<2x16xf32>
      %67 = arith.subf %60, %66 : vector<2x16xf32>
      %68 = math.exp %67 : vector<2x16xf32>
      %cst_33 = arith.constant dense<0.000000e+00> : vector<2xf32>
      %69 = vector.multi_reduction <add>, %68, %cst_33 [1] : vector<2x16xf32> to vector<2xf32>
      %70 = vector.shape_cast %69 : vector<2xf32> to vector<2x1xf32>
      %71 = vector.broadcast %65 : vector<2x1xf32> to vector<2x16xf32>
      %72 = arith.subf %60, %71 : vector<2x16xf32>
      %73 = math.log %70 : vector<2x1xf32>
      %74 = vector.broadcast %73 : vector<2x1xf32> to vector<2x16xf32>
      %75 = arith.subf %72, %74 : vector<2x16xf32>
      %c0_34 = arith.constant 0 : index
      %c0_35 = arith.constant 0 : index
      %76 = vector.load %arg9[%c0_34, %c0_35] : memref<2x16xf32, #tpu.memory_space<vmem>>, vector<2x16xf32>
      tpu.vector_store %arg9[%c0_34, %c0_35], %75 {strides = array<i32>} : memref<2x16xf32, #tpu.memory_space<vmem>>, vector<2x16xf32>,
      %cst_36 = arith.constant dense<0xFF800000> : vector<2xf32>
      %77 = vector.multi_reduction <maximumf>, %62, %cst_36 [1] : vector<2x16xf32> to vector<2xf32>
      %78 = vector.shape_cast %77 : vector<2xf32> to vector<2x1xf32>
      %79 = vector.broadcast %78 : vector<2x1xf32> to vector<2x16xf32>
      %80 = arith.subf %62, %79 : vector<2x16xf32>
      %81 = math.exp %80 : vector<2x16xf32>
      %cst_37 = arith.constant dense<0.000000e+00> : vector<2xf32>
      %82 = vector.multi_reduction <add>, %81, %cst_37 [1] : vector<2x16xf32> to vector<2xf32>
      %83 = vector.shape_cast %82 : vector<2xf32> to vector<2x1xf32>
      %84 = vector.broadcast %78 : vector<2x1xf32> to vector<2x16xf32>
      %85 = arith.subf %62, %84 : vector<2x16xf32>
      %86 = math.log %83 : vector<2x1xf32>
      %87 = vector.broadcast %86 : vector<2x1xf32> to vector<2x16xf32>
      %88 = arith.subf %85, %87 : vector<2x16xf32>
      %c0_38 = arith.constant 0 : index
      %c0_39 = arith.constant 0 : index
      %89 = vector.load %arg10[%c0_38, %c0_39] : memref<2x16xf32, #tpu.memory_space<vmem>>, vector<2x16xf32>
      tpu.vector_store %arg10[%c0_38, %c0_39], %88 {strides = array<i32>} : memref<2x16xf32, #tpu.memory_space<vmem>>, vector<2x16xf32>,
    } else {
    }
    return
  }
  func.func @transform_0(%arg0: i32) -> (i32, i32) {
    %c0_i32 = arith.constant 0 : i32
    %c0_i32_0 = arith.constant 0 : i32
    return %arg0, %c0_i32 : i32, i32
  }
  func.func @transform_1(%arg0: i32) -> (i32, i32) {
    %c0_i32 = arith.constant 0 : i32
    %c0_i32_0 = arith.constant 0 : i32
    %c0_i32_1 = arith.constant 0 : i32
    return %c0_i32, %c0_i32_0 : i32, i32
  }
  func.func @transform_2(%arg0: i32) -> (i32, i32) {
    %c0_i32 = arith.constant 0 : i32
    %c0_i32_0 = arith.constant 0 : i32
    %c0_i32_1 = arith.constant 0 : i32
    return %c0_i32, %c0_i32_0 : i32, i32
  }
  func.func @transform_3(%arg0: i32) -> (i32, i32) {
    %c0_i32 = arith.constant 0 : i32
    %c0_i32_0 = arith.constant 0 : i32
    %c0_i32_1 = arith.constant 0 : i32
    return %c0_i32, %c0_i32_0 : i32, i32
  }
  func.func @transform_4(%arg0: i32) -> (i32, i32) {
    %c0_i32 = arith.constant 0 : i32
    %c0_i32_0 = arith.constant 0 : i32
    %c0_i32_1 = arith.constant 0 : i32
    return %c0_i32, %c0_i32_0 : i32, i32
  }
  func.func @transform_5(%arg0: i32) -> (i32, i32) {
    %c0_i32 = arith.constant 0 : i32
    %c0_i32_0 = arith.constant 0 : i32
    %c0_i32_1 = arith.constant 0 : i32
    return %c0_i32, %c0_i32_0 : i32, i32
  }
  func.func @transform_6(%arg0: i32) -> (i32, i32) {
    %c0_i32 = arith.constant 0 : i32
    %c0_i32_0 = arith.constant 0 : i32
    %c0_i32_1 = arith.constant 0 : i32
    return %c0_i32, %c0_i32_0 : i32, i32
  }
  func.func @transform_7(%arg0: i32) -> (i32, i32) {
    %c0_i32 = arith.constant 0 : i32
    %c0_i32_0 = arith.constant 0 : i32
    %c0_i32_1 = arith.constant 0 : i32
    return %c0_i32, %c0_i32_0 : i32, i32
  }
  func.func @transform_8(%arg0: i32) -> (i32, i32) {
    %c0_i32 = arith.constant 0 : i32
    %c0_i32_0 = arith.constant 0 : i32
    %c0_i32_1 = arith.constant 0 : i32
    return %c0_i32, %c0_i32_0 : i32, i32
  }
  func.func @transform_9(%arg0: i32) -> (i32, i32) {
    %c0_i32 = arith.constant 0 : i32
    %c0_i32_0 = arith.constant 0 : i32
    %c0_i32_1 = arith.constant 0 : i32
    return %c0_i32, %c0_i32_0 : i32, i32
  }
}

</mosaic_0001>

<bundles_post_ra>
// kernel: esn_forward.1
= control target key start
LH: loop header
LB: loop body
LE: loop exit
PB: predicated region body
PF: predicated region fallthrough
CT: control target
= control target key end

     0   :  { %15 = vsyncpa [#allocation4], 0  ;;  %s1270_s30 = smov 0   ;;  %s1489_s0 = inlined_call_operand.vmem [shape: bf16[32,64], index: 0, kind: input, shape index: {}]   ;;  %s1490_s1 = inlined_call_operand.vmem [shape: bf16[64,128], index: 1, kind: input, shape index: {}]   ;;  %s1491_s2 = inlined_call_operand.vmem [shape: bf16[128,128], index: 2, kind: input, shape index: {}]   ;;  %s1492_s3 = inlined_call_operand.vmem [shape: bf16[128,128], index: 3, kind: input, shape index: {}]   ;;  %s1493_s4 = inlined_call_operand.vmem [shape: f32[1,128], index: 4, kind: input, shape index: {}]   ;;  %s1494_s5 = inlined_call_operand.vmem [shape: bf16[128,16], index: 5, kind: input, shape index: {}]   ;;  %s1495_s6 = inlined_call_operand.vmem [shape: bf16[128,16], index: 6, kind: input, shape index: {}]   ;;  %s1496_s7 = inlined_call_operand.hbm [shape: f32[2,128], index: 7, kind: output, shape index: {0}]   ;;  %s1497_s8 = inlined_call_operand.vmem [shape: f32[2,16], index: 8, kind: output, shape index: {1}]   ;;  %s1498_s9 = inlined_call_operand.vmem [shape: f32[2,16], index: 9, kind: output, shape index: {2}]  }
   0x1 LB: > { %s1276_s10 = sadd.s32 4294967295, %s1216_s30   ;;  %p942_p0 = scmp.ge.s32.totalorder %s1216_s30, 1  ;;  %s1216_s30 = sphi %s1270_s30, %s21_s30  }
   0x2   : > { %p279_p1 = scmp.lt.s32.totalorder %s1216_s30, 3 }
   0x4   : > { %p280_p2 = pnand %p942_p0, %p279_p1 }
   0x5   : > { %s943_s11 = sshll.u32 (!%p280_p2), %s1276_s10, 1  ;;  %p945_p4 = scmp.ne.s32.totalorder (!%p280_p2), %s1276_s10, 0 }
   0x6   : > { %283 = sbr.rel (%p280_p2) target bundleno = 1735 (0x6c7), region = 48  ;;  %p311_p3 = scmp.lt.s32.totalorder (!%p280_p2), %s943_s11, 3 }
   0xb   : > { %s1500_s11 = smov (!%p311_p3, %s943_s11), 3  ;;  %320 = sbr.rel (%p945_p4) target bundleno = 18 (0x12), region = 52 }
   0xc   : > { %s944_s12 = sshll.u32 %s1500_s11, 2 }
   0xd   : > { %s1284_s15 = scalar_lea.vmem %s1489_s0, %s944_s12 }
  0x10   : > { %v1218_v0 = vmov 0.0  }
  0x11   : > { %321 = vst [vmem:[#allocation2] sm:$0x3] %v1218_v0 }
  0x12 PF: > { %v1104_v1 = vld [vmem:[%s1490_s1 + $0x18] sm:$0xff]  ;;  %v1103_v3 = vld [vmem:[%s1490_s1 + $0x10] sm:$0xff]  ;;  %v1102_v7 = vld [vmem:[%s1490_s1 + $0x8] sm:$0xff]  ;;  %vm361_vm0 = vcmask 523264   ;;  %p1031_p5 = scmp.ne.s32.totalorder %s1276_s10, 1 }
  0x13   : > { %v1293_v2 = vld [vmem:[%s1492_s3 + $0x38] sm:$0xff]  ;;  %369 = vmatpush.bf16.msra.mxu0 %v1104_v1  ;;  %v1305_v5 = vld [vmem:[%s1492_s3 + $0x30] sm:$0xff]  ;;  %v1318_v8 = vld [vmem:[%s1492_s3 + $0x28] sm:$0xff] }
  0x14   : > { %v1112_v4 = vld [vmem:[%s1491_s2 + $0x38] sm:$0xff]  ;;  %528 = vmatpush.bf16.msra.mxu2 %v1293_v2  ;;  %544 = vmatpush.bf16.msra.mxu3 %v1293_v2  ;;  %v1111_v6 = vld [vmem:[%s1491_s2 + $0x30] sm:$0xff]  ;;  %v1110_v9 = vld [vmem:[%s1491_s2 + $0x28] sm:$0xff] }
  0x15   : > { %448 = vmatpush.bf16.msra.mxu1 %v1112_v4  ;;  %v1101_v10 = vld [vmem:[%s1490_s1] sm:$0xff]  ;;  %v1342_v14 = vld [vmem:[%s1492_s3 + $0x18] sm:$0xff]  ;;  %v1353_v16 = vld [vmem:[%s1492_s3 + $0x10] sm:$0xff] }
  0x16   : > { %v1331_v11 = vld [vmem:[%s1492_s3 + $0x20] sm:$0xff]  ;;  %v1108_v15 = vld [vmem:[%s1491_s2 + $0x18] sm:$0xff]  ;;  %v1361_v17 = vld [vmem:[%s1492_s3 + $0x8] sm:$0xff] }
  0x17   : > { %370 = vmatpush.bf16.msra.mxu0 %v1103_v3  ;;  %v1109_v12 = vld [vmem:[%s1491_s2 + $0x20] sm:$0xff]  ;;  %v1107_v21 = vld [vmem:[%s1491_s2 + $0x10] sm:$0xff]  ;;  %v1106_v22 = vld [vmem:[%s1491_s2 + $0x8] sm:$0xff] }
  0x18   : > { %529 = vmatpush.bf16.msra.mxu2 %v1305_v5  ;;  %545 = vmatpush.bf16.msra.mxu3 %v1305_v5  ;;  %v1100_v13 = vld [vmem:[%s1284_s15] sm:$0xff] }
  0x19   : > { %449 = vmatpush.bf16.msra.mxu1 %v1111_v6  ;;  %v1113_v18 = vld [vmem:[%s1492_s3] sm:$0xff] }
  0x1a   : > { %v478_v19 = vld [vmem:[#allocation2] sm:$0x3] }
  0x1b   : > { %371 = vmatpush.bf16.msra.mxu0 %v1102_v7  ;;  %v479_v20 = vpack.c.bf16 %v478_v19, %v478_v19  ;;  %v1105_v23 = vld [vmem:[%s1491_s2] sm:$0xff] }
  0x1c   : > { %530 = vmatpush.bf16.msra.mxu2 %v1318_v8  ;;  %546 = vmatpush.bf16.msra.mxu3 %v1318_v8  ;;  %v1153_v29 = vld [vmem:[%s1493_s4] ss:$0 sm:$0xff] }
  0x1d   : > { %450 = vmatpush.bf16.msra.mxu1 %v1110_v9 }
  0x1f   : > { %372 = vmatpush.bf16.msra.mxu0 %v1101_v10 }
  0x20   : > { %531 = vmatpush.bf16.msra.mxu2 %v1331_v11  ;;  %547 = vmatpush.bf16.msra.mxu3 %v1331_v11 }
  0x21   : > { %451 = vmatpush.bf16.msra.mxu1 %v1109_v12 }
  0x22   : > { %966 = vmatmul.msk.bf16.vlgmr.msra.gmra.mxu0 %vm361_vm0, %v1100_v13 }
  0x23   : > { %566 = vmatpush.bf16.msrb.mxu0 %v1293_v2 }
  0x24   : > { %532 = vmatpush.bf16.msra.mxu2 %v1342_v14  ;;  %548 = vmatpush.bf16.msra.mxu3 %v1342_v14 }
  0x25   : > { %452 = vmatpush.bf16.msra.mxu1 %v1108_v15 }
  0x27   : > { %567 = vmatpush.bf16.msrb.mxu0 %v1305_v5 }
  0x28   : > { %533 = vmatpush.bf16.msra.mxu2 %v1353_v16  ;;  %549 = vmatpush.bf16.msra.mxu3 %v1353_v16 }
  0x29   : > { %453 = vmatpush.bf16.msra.mxu1 %v1107_v21 }
  0x2b   : > { %568 = vmatpush.bf16.msrb.mxu0 %v1318_v8 }
  0x2c   : > { %534 = vmatpush.bf16.msra.mxu2 %v1361_v17  ;;  %550 = vmatpush.bf16.msra.mxu3 %v1361_v17 }
  0x2d   : > { %454 = vmatpush.bf16.msra.mxu1 %v1106_v22 }
  0x2f   : > { %569 = vmatpush.bf16.msrb.mxu0 %v1331_v11 }
  0x30   : > { %535 = vmatpush.bf16.msra.mxu2 %v1113_v18  ;;  %551 = vmatpush.bf16.msra.mxu3 %v1113_v18 }
  0x31   : > { %455 = vmatpush.bf16.msra.mxu1 %v1105_v23 }
  0x33   : > { %570 = vmatpush.bf16.msrb.mxu0 %v1342_v14  ;;  %536 = vmatmul.bf16.vlgmr.msra.gmra.mxu2 %v479_v20 }
  0x34   : > { %610 = vmatpush.bf16.msrb.mxu2 %v1293_v2  ;;  %626 = vmatpush.bf16.msrb.mxu3 %v1293_v2 }
  0x35   : > { %588 = vmatpush.bf16.msrb.mxu1 %v1293_v2 }
  0x37   : > { %571 = vmatpush.bf16.msrb.mxu0 %v1353_v16 }
  0x38   : > { %611 = vmatpush.bf16.msrb.mxu2 %v1305_v5  ;;  %627 = vmatpush.bf16.msrb.mxu3 %v1305_v5 }
  0x39   : > { %589 = vmatpush.bf16.msrb.mxu1 %v1305_v5 }
  0x3b   : > { %572 = vmatpush.bf16.msrb.mxu0 %v1361_v17 }
  0x3c   : > { %612 = vmatpush.bf16.msrb.mxu2 %v1318_v8  ;;  %628 = vmatpush.bf16.msrb.mxu3 %v1318_v8 }
  0x3d   : > { %590 = vmatpush.bf16.msrb.mxu1 %v1318_v8 }
  0x3f   : > { %573 = vmatpush.bf16.msrb.mxu0 %v1113_v18 }
  0x40   : > { %613 = vmatpush.bf16.msrb.mxu2 %v1331_v11  ;;  %629 = vmatpush.bf16.msrb.mxu3 %v1331_v11 }
  0x41   : > { %591 = vmatpush.bf16.msrb.mxu1 %v1331_v11 }
  0x43   : > { %648 = vmatpush.bf16.msra.mxu0 %v1293_v2 }
  0x44   : > { %614 = vmatpush.bf16.msrb.mxu2 %v1342_v14  ;;  %630 = vmatpush.bf16.msrb.mxu3 %v1342_v14 }
  0x45   : > { %592 = vmatpush.bf16.msrb.mxu1 %v1342_v14 }
  0x47   : > { %649 = vmatpush.bf16.msra.mxu0 %v1305_v5 }
  0x48   : > { %615 = vmatpush.bf16.msrb.mxu2 %v1353_v16  ;;  %631 = vmatpush.bf16.msrb.mxu3 %v1353_v16 }
  0x49   : > { %593 = vmatpush.bf16.msrb.mxu1 %v1353_v16 }
  0x4b   : > { %650 = vmatpush.bf16.msra.mxu0 %v1318_v8 }
  0x4c   : > { %616 = vmatpush.bf16.msrb.mxu2 %v1361_v17  ;;  %632 = vmatpush.bf16.msrb.mxu3 %v1361_v17 }
  0x4d   : > { %594 = vmatpush.bf16.msrb.mxu1 %v1361_v17 }
  0x4f   : > { %651 = vmatpush.bf16.msra.mxu0 %v1331_v11 }
  0x50   : > { %617 = vmatpush.bf16.msrb.mxu2 %v1113_v18  ;;  %633 = vmatpush.bf16.msrb.mxu3 %v1113_v18 }
  0x51   : > { %595 = vmatpush.bf16.msrb.mxu1 %v1113_v18 }
  0x53   : > { %652 = vmatpush.bf16.msra.mxu0 %v1342_v14 }
  0x57   : > { %653 = vmatpush.bf16.msra.mxu0 %v1353_v16 }
  0x5b   : > { %654 = vmatpush.bf16.msra.mxu0 %v1361_v17 }
  0x5f   : > { %655 = vmatpush.bf16.msra.mxu0 %v1113_v18 }
  0x9f   : > { %v374_v24 = vpop.f32.mrf.mxu0 }
  0xa7   : > { %v376_v25 = vpop.f32.mrf.mxu0 }
  0xa8   : > { %v379_v26 = vpack.c.bf16 %v376_v25, %v374_v24 }
  0xaa   : > { %456 = vmatmul.bf16.vlgmr.msra.gmra.mxu1 %v379_v26 }
  0xab   : > { %670 = vmatpush.bf16.msra.mxu1 %v1293_v2 }
  0xaf   : > { %671 = vmatpush.bf16.msra.mxu1 %v1305_v5 }
  0xb3   : > { %672 = vmatpush.bf16.msra.mxu1 %v1318_v8 }
  0xb6   : > { %v537_v27 = vpop.f32.mrf.mxu2 }
  0xb7   : > { %673 = vmatpush.bf16.msra.mxu1 %v1331_v11 }
  0xbb   : > { %674 = vmatpush.bf16.msra.mxu1 %v1342_v14 }
  0xbe   : > { %v539_v28 = vpop.f32.mrf.mxu2 }
  0xbf   : > { %675 = vmatpush.bf16.msra.mxu1 %v1353_v16 }
  0xc3   : > { %676 = vmatpush.bf16.msra.mxu1 %v1361_v17 }
  0xc7   : > { %677 = vmatpush.bf16.msra.mxu1 %v1113_v18 }
 0x127   : > { %v457_v30 = vpop.f32.mrf.mxu1 }
 0x128   : > { %v458_v31 = vadd.f32 %v1153_v29, %v457_v30 }
 0x12a   : > { %v541_v32 = vadd.f32 %v537_v27, %v458_v31 }
 0x12c   : > { %1154 = vtanh.f32 %v541_v32 }
 0x12f   : > { %v459_v49 = vpop.f32.mrf.mxu1 }
 0x130   : > { %v460_v57 = vadd.f32 %v1153_v29, %v459_v49 }
 0x132   : > { %v1155_v33 = vpop.eup %1154 }
 0x133   : > { %v543_v34 = vpack.c.bf16 %v1155_v33, %v1155_v33 }
 0x135   : > { %552 = vmatmul.bf16.vlgmr.msra.gmra.mxu3 %v543_v34 }
 0x1b8   : > { %v553_v35 = vpop.f32.mrf.mxu3 }
 0x1b9   : > { %v558_v36 = vrot.slane %v553_v35, 6 }
 0x1bb   : > { %v560_v37 = vadd.f32 %v558_v36, %v458_v31 }
 0x1bd   : > { %1156 = vtanh.f32 %v560_v37 }
 0x1c0   : > { %v555_v38 = vpop.f32.mrf.mxu3 }
 0x1c3   : > { %v1157_v39 = vpop.eup %1156 }
 0x1c4   : > { %v562_v40 = vpack.c.bf16 %v1157_v39, %v1157_v39 }
 0x1c6   : > { %v564_v41 = vrot.slane %v562_v40, 1 }
 0x1c8   : > { %574 = vmatmul.bf16.vlgmr.msrb.gmra.mxu0 %v564_v41 }
 0x245   : > { %v575_v42 = vpop.f32.mrf.mxu0 }
 0x246   : > { %v580_v43 = vrot.slane %v575_v42, 4 }
 0x248   : > { %v582_v44 = vadd.f32 %v580_v43, %v458_v31 }
 0x24a   : > { %1158 = vtanh.f32 %v582_v44 }
 0x24d   : > { %v577_v45 = vpop.f32.mrf.mxu0 }
 0x250   : > { %v1159_v46 = vpop.eup %1158 }
 0x251   : > { %v584_v47 = vpack.c.bf16 %v1159_v46, %v1159_v46 }
 0x253   : > { %v586_v48 = vrot.slane %v584_v47, 2 }
 0x255   : > { %596 = vmatmul.bf16.vlgmr.msrb.gmra.mxu1 %v586_v48 }
 0x2d2   : > { %v597_v50 = vpop.f32.mrf.mxu1 }
 0x2d3   : > { %v602_v51 = vrot.slane %v597_v50, 2 }
 0x2d5   : > { %v604_v52 = vadd.f32 %v602_v51, %v458_v31 }
 0x2d7   : > { %1160 = vtanh.f32 %v604_v52 }
 0x2da   : > { %v599_v53 = vpop.f32.mrf.mxu1 }
 0x2dd   : > { %v1161_v54 = vpop.eup %1160 }
 0x2de   : > { %v606_v55 = vpack.c.bf16 %v1161_v54, %v1161_v54 }
 0x2e0   : > { %v608_v56 = vrot.slane %v606_v55, 3 }
 0x2e2   : > { %618 = vmatmul.bf16.vlgmr.msrb.gmra.mxu2 %v608_v56 }
 0x365   : > { %v619_v58 = vpop.f32.mrf.mxu2 }
 0x366   : > { %v623_v59 = vadd.f32 %v619_v58, %v460_v57 }
 0x368   : > { %1162 = vtanh.f32 %v623_v59 }
 0x36d   : > { %v621_v60 = vpop.f32.mrf.mxu2 }
 0x36e   : > { %v1163_v61 = vpop.eup %1162 }
 0x36f   : > { %v625_v62 = vpack.c.bf16 %v1163_v61, %v1163_v61 }
 0x371   : > { %634 = vmatmul.bf16.vlgmr.msrb.gmra.mxu3 %v625_v62 }
 0x3f4   : > { %v635_v63 = vpop.f32.mrf.mxu3 }
 0x3f5   : > { %v640_v0 = vrot.slane %v635_v63, 6 }
 0x3f7   : > { %v642_v1 = vadd.f32 %v640_v0, %v460_v57 }
 0x3f9   : > { %1164 = vtanh.f32 %v642_v1 }
 0x3fc   : > { %v637_v2 = vpop.f32.mrf.mxu3 }
 0x3ff   : > { %v1165_v3 = vpop.eup %1164 }
 0x400   : > { %v644_v4 = vpack.c.bf16 %v1165_v3, %v1165_v3 }
 0x402   : > { %v646_v5 = vrot.slane %v644_v4, 1 }
 0x404   : > { %656 = vmatmul.bf16.vlgmr.msra.gmra.mxu0 %v646_v5 }
 0x481   : > { %v657_v6 = vpop.f32.mrf.mxu0 }
 0x482   : > { %v662_v7 = vrot.slane %v657_v6, 4 }
 0x484   : > { %v664_v8 = vadd.f32 %v662_v7, %v460_v57 }
 0x486   : > { %1166 = vtanh.f32 %v664_v8 }
 0x489   : > { %v659_v9 = vpop.f32.mrf.mxu0 }
 0x48c   : > { %v1167_v10 = vpop.eup %1166 }
 0x48d   : > { %v666_v11 = vpack.c.bf16 %v1167_v10, %v1167_v10 }
 0x48f   : > { %v668_v12 = vrot.slane %v666_v11, 2 }
 0x491   : > { %678 = vmatmul.bf16.vlgmr.msra.gmra.mxu1 %v668_v12 }
 0x50e   : > { %v679_v13 = vpop.f32.mrf.mxu1 }
 0x50f   : > { %v684_v14 = vrot.slane %v679_v13, 2 }
 0x511   : > { %v686_v15 = vadd.f32 %v684_v14, %v460_v57 }
 0x513   : > { %1168 = vtanh.f32 %v686_v15 }
 0x516   : > { %v681_v16 = vpop.f32.mrf.mxu1  ;;  %692 = sbr.rel (%p1031_p5) target bundleno = 1730 (0x6c2), region = 56 }
 0x519   : > { %v1169_v17 = vpop.eup %1168 }
 0x51a   : > { %688 = vst [vmem:[#allocation2 - $0x6] sm:$0xc0] %v1169_v17 }
 0x51b   : > { %v1128_v18 = vld [vmem:[%s1494_s5 + $0x38] sm:$0xff]  ;;  %851 = vst [vmem:[#allocation3 - $0x6] sm:$0xc0] %v1169_v17  ;;  %v1127_v20 = vld [vmem:[%s1494_s5 + $0x30] sm:$0xff]  ;;  %v1126_v22 = vld [vmem:[%s1494_s5 + $0x28] sm:$0xff]  ;;  %v693_v32 = vpack.c.bf16 %v1169_v17, %v1169_v17  ;;  %vm852_vm1 = vcmask 123904  }
 0x51c   : > { %v1136_v19 = vld [vmem:[%s1495_s6 + $0x38] sm:$0xff]  ;;  %761 = vmatpush.bf16.msra.mxu0 %v1128_v18  ;;  %v1135_v21 = vld [vmem:[%s1495_s6 + $0x30] sm:$0xff]  ;;  %v1134_v23 = vld [vmem:[%s1495_s6 + $0x28] sm:$0xff] }
 0x51d   : > { %838 = vmatpush.bf16.msra.mxu1 %v1136_v19  ;;  %v1125_v24 = vld [vmem:[%s1494_s5 + $0x20] sm:$0xff]  ;;  %v1124_v26 = vld [vmem:[%s1494_s5 + $0x18] sm:$0xff]  ;;  %v1123_v28 = vld [vmem:[%s1494_s5 + $0x10] sm:$0xff]  ;;  %v711_v35 = vrot.slane %v693_v32, 3 }
 0x51e   : > { %v1133_v25 = vld [vmem:[%s1495_s6 + $0x20] sm:$0xff]  ;;  %v1132_v27 = vld [vmem:[%s1495_s6 + $0x18] sm:$0xff]  ;;  %v1131_v29 = vld [vmem:[%s1495_s6 + $0x10] sm:$0xff] }
 0x51f   : > { %v1122_v30 = vld [vmem:[%s1494_s5 + $0x8] sm:$0xff]  ;;  %v1121_v33 = vld [vmem:[%s1494_s5] sm:$0xff] }
 0x520   : > { %762 = vmatpush.bf16.msra.mxu0 %v1127_v20  ;;  %v1130_v31 = vld [vmem:[%s1495_s6 + $0x8] sm:$0xff]  ;;  %v1129_v34 = vld [vmem:[%s1495_s6] sm:$0xff] }
 0x521   : > { %839 = vmatpush.bf16.msra.mxu1 %v1135_v21 }
 0x524   : > { %763 = vmatpush.bf16.msra.mxu0 %v1126_v22 }
 0x525   : > { %840 = vmatpush.bf16.msra.mxu1 %v1134_v23 }
 0x528   : > { %764 = vmatpush.bf16.msra.mxu0 %v1125_v24 }
 0x529   : > { %841 = vmatpush.bf16.msra.mxu1 %v1133_v25 }
 0x52c   : > { %765 = vmatpush.bf16.msra.mxu0 %v1124_v26 }
 0x52d   : > { %842 = vmatpush.bf16.msra.mxu1 %v1132_v27 }
 0x530   : > { %766 = vmatpush.bf16.msra.mxu0 %v1123_v28 }
 0x531   : > { %843 = vmatpush.bf16.msra.mxu1 %v1131_v29 }
 0x534   : > { %767 = vmatpush.bf16.msra.mxu0 %v1122_v30 }
 0x535   : > { %844 = vmatpush.bf16.msra.mxu1 %v1130_v31 }
 0x538   : > { %768 = vmatpush.bf16.msra.mxu0 %v1121_v33 }
 0x539   : > { %845 = vmatpush.bf16.msra.mxu1 %v1129_v34 }
 0x53b   : > { %769 = vmatmul.bf16.vlgmr.msra.gmra.mxu0 %v711_v35 }
 0x53c   : > { %846 = vmatmul.bf16.vlgmr.msra.gmra.mxu1 %v711_v35 }
 0x5b8   : > { %v770_v36 = vpop.f32.mrf.mxu0 }
 0x5b9   : > { %v847_v37 = vpop.f32.mrf.mxu1  ;;  %v853_v38 = vsel %vm852_vm1, %v770_v36, -inf }
 0x5ba   : > { %854 = vmax.xlane.f32.xlu0 %v853_v38  ;;  %v866_v39 = vsel %vm852_vm1, %v847_v37, -inf }
 0x5c0   : > { %v772_v40 = vpop.f32.mrf.mxu0 }
 0x5c1   : > { %v849_v41 = vpop.f32.mrf.mxu1 }
 0x5c2   : > { %867 = vmax.xlane.f32.xlu0 %v866_v39 }
 0x62d   : > { %v855_v42 = vpop.xlane.xlu0 %854 }
 0x62e   : > { %v856_v43 = vsub.f32 %v770_v36, %v855_v42 }
 0x630   : > { %v857_v44 = vmul.f32 1.442695, %v856_v43 }
 0x632   : > { %1170 = vpow2.f32 %v857_v44 }
 0x635   : > { %v868_v45 = vpop.xlane.xlu0 %867 }
 0x636   : > { %v869_v46 = vsub.f32 %v847_v37, %v868_v45 }
 0x638   : > { %v1171_v47 = vpop.eup %1170  ;;  %v870_v48 = vmul.f32 1.442695, %v869_v46 }
 0x639   : > { %v859_v49 = vsel %vm852_vm1, %v1171_v47, 0.0 }
 0x63a   : > { %1172 = vpow2.f32 %v870_v48  ;;  %860 = vadd.xlane.f32.xlu1 %v859_v49 }
 0x640   : > { %v1173_v50 = vpop.eup %1172 }
 0x641   : > { %v872_v51 = vsel %vm852_vm1, %v1173_v50, 0.0 }
 0x642   : > { %873 = vadd.xlane.f32.xlu1 %v872_v51 }
 0x6ad   : > { %v861_v52 = vpop.xlane.xlu1 %860 }
 0x6ae   : > { %1174 = vlog2.f32 %v861_v52 }
 0x6b4   : > { %v1175_v53 = vpop.eup %1174 }
 0x6b5   : > { %v863_v54 = vmul.f32 0.6931472, %v1175_v53  ;;  %v874_v55 = vpop.xlane.xlu1 %873 }
 0x6b6   : > { %1176 = vlog2.f32 %v874_v55 }
 0x6b7   : > { %v864_v56 = vsub.f32 %v856_v43, %v863_v54 }
 0x6b9   : > { %865 = vst.msk [vmem:[%s1497_s8] sm:$0x3] %vm852_vm1, %v864_v56 }
 0x6bc   : > { %v1177_v57 = vpop.eup %1176 }
 0x6bd   : > { %v876_v58 = vmul.f32 0.6931472, %v1177_v57 }
 0x6bf   : > { %v877_v59 = vsub.f32 %v869_v46, %v876_v58 }
 0x6c1   : > { %878 = vst.msk [vmem:[%s1498_s9] sm:$0x3] %vm852_vm1, %v877_v59 }
 0x6c2 PF: > { %p1141_p6 = scmp.eq.s32.totalorder %s1276_s10, 1  ;;  %s1219_s19 = smov [#allocation3]  }
 0x6c3   : > { %s885_s20 = sshll.u32 %s1219_s19, 4  ;;  %s887_s23 = sshll.u32 %s1496_s7, 4  ;;  %s886_s20 = int_to_ptr.vmem [resolvable:$true] %s885_s20  ;;  %s888_s23 = int_to_ptr.hbm [resolvable:$true] %s887_s23 }
 0x6c4   : > { %1138 = dma.vmem_to_hbm [thread:$0]  (%p1141_p6), %s886_s20, 32, %s888_s23, [#allocation4]  }
 0x6c5   : > { %1211 = dma.done.wait (%p1141_p6), [#allocation4], 32  }
 0x6c6   : > { %1213 = vsyncadd (%p1141_p6), [#allocation4], 4294967264 }
 0x6c7 PF: > { %s21_s30 = sadd.s32 1, %s1216_s30  }
 0x6c8   : > { %p18_p7 = scmp.ge.s32.totalorder %s21_s30, 4  }
 0x6ca   :  { %20 = sbr.rel (!%p18_p7) target bundleno = 1 (0x1), region = 99 }
 0x6cf   :  { %913 = vsyncpa [#allocation4], 1 }
 0x6d0   :  { %915 = vsyncpa [#allocation4 + $0x1], 1 }

</bundles_post_ra>
